<compile_context>
chip_gen: v5e
topology: v5e:2x2
jax: 0.10.0
libtpu: 0.0.40
codegen_flags: <defaults>
</compile_context>

<pallas_src>
import functools
import math

import jax
import jax.numpy as jnp
from jax import lax
from jax.experimental import pallas as pl
from jax.experimental.pallas import tpu as pltpu

_INV_SQRT2 = 1.0 / math.sqrt(2.0)


def _round_up(n, m):
    return ((n + m - 1) // m) * m


def _vmem_budget_bytes():
    """Generation-aware scoped-VMEM budget: ~108 MiB on 128 MiB parts (v5e/v6e),
    ~52 MiB on 64 MiB/TC parts (v7x).  Falls back to the conservative 64 MiB
    assumption if the query is unavailable."""
    cap = 64 * 1024 * 1024
    try:
        info = pltpu.get_tpu_info()
        cap = int(getattr(info, "vmem_capacity_bytes", cap))
    except Exception:
        pass
    budget = min(cap - (12 << 20), (cap * 17) // 20)
    return max(budget, 16 << 20)


# ---------------------------------------------------------------------------
# Math helpers.
# ---------------------------------------------------------------------------
def _erf_approx(x):
    """Abramowitz & Stegun 7.1.26 erf approximation (max abs err ~1.5e-7).
    Built only from mul/add/div/exp/where so it lowers cleanly in Mosaic
    (lax.erf has no in-kernel lowering)."""
    a1, a2, a3, a4, a5 = 0.254829592, -0.284496736, 1.421413741, -1.453152027, 1.061405429
    p = 0.3275911
    z = jnp.abs(x)
    t = 1.0 / (1.0 + p * z)
    poly = ((((a5 * t + a4) * t + a3) * t + a2) * t + a1) * t
    y = 1.0 - poly * jnp.exp(-z * z)
    return jnp.where(x < 0.0, -y, y)


def _gelu_exact(x):
    """Exact (erf) GELU — PyTorch nn.GELU() default.  Host/XLA side only."""
    return 0.5 * x * (1.0 + lax.erf(x * _INV_SQRT2))


def _gelu_kernel(x):
    """In-kernel GELU using the erf polynomial approximation."""
    return 0.5 * x * (1.0 + _erf_approx(x * _INV_SQRT2))


def _excite_host(y, w1, w2):
    """y: (B, C) f32 pooled means -> (B, C) f32 sigmoid gates (plain JAX)."""
    h = jnp.dot(y, w1.astype(jnp.float32), preferred_element_type=jnp.float32)
    h = _gelu_exact(h)
    s = jnp.dot(h, w2.astype(jnp.float32), preferred_element_type=jnp.float32)
    return jax.nn.sigmoid(s)


def _excite_in_kernel(y, w1, w2):
    """y: (1, C) f32 -> (1, C) f32 gates.  The MLP is tiny (C x C/r), so run it
    as broadcast-multiply + cross-sublane reduce on the VPU/XLU instead of a
    <1%-utilized MXU dot."""
    w1f = w1.astype(jnp.float32)
    w2f = w2.astype(jnp.float32)
    h = jnp.sum(y[:, :, None] * w1f[None, :, :], axis=1)        # (1, Cr)
    h = _gelu_kernel(h)
    s = jnp.sum(h[:, :, None] * w2f[None, :, :], axis=1)        # (1, C)
    return jax.nn.sigmoid(s)


# ---------------------------------------------------------------------------
# Path A: fused single pass (grid over batch), for slabs that fit VMEM.
# ---------------------------------------------------------------------------
def _se_fused_kernel(x_ref, w1_ref, w2_ref, o_ref, *, inv_hw):
    """x_ref/o_ref: (1, C, HW); w1_ref: (C, Cr); w2_ref: (Cr, C)."""
    # Re-index x_ref for pool and rescale (don't keep the whole slab live in
    # vregs across the MLP section); VMEM reloads are free under the DMA roofline.
    y = jnp.sum(x_ref[...], axis=-1, dtype=jnp.float32) * inv_hw   # (1, C) true mean
    s = _excite_in_kernel(y, w1_ref[...], w2_ref[...])             # (1, C) gates
    o_ref[...] = x_ref[...] * s[:, :, None].astype(o_ref.dtype)


# ---------------------------------------------------------------------------
# Path B, phase 1: tiled pool over HW (mean only; MLP is hoisted to JAX).
# ---------------------------------------------------------------------------
def _se_pool_kernel(x_ref, mean_ref, acc_ref, *, inv_hw, tile, hw, mask_tail):
    """x_ref: (1, C, tile); mean_ref: (1, C, 1) f32; acc_ref: (1, C) f32 scratch."""
    t = pl.program_id(1)

    @pl.when(t == 0)
    def _():
        acc_ref[...] = jnp.zeros_like(acc_ref)

    x = x_ref[...]
    if mask_tail:
        # Last tile may run past HW: OOB lanes are undefined -> zero them.
        lane = lax.broadcasted_iota(jnp.int32, x.shape, 2) + t * tile
        x = jnp.where(lane < hw, x, jnp.zeros_like(x))
    acc_ref[...] += jnp.sum(x, axis=-1, dtype=jnp.float32)

    @pl.when(t == pl.num_programs(1) - 1)
    def _():
        mean_ref[...] = (acc_ref[...] * inv_hw)[:, :, None]


# ---------------------------------------------------------------------------
# Path B, phase 2: broadcast rescale over a fully parallel (batch, HW-tile) grid.
# ---------------------------------------------------------------------------
def _se_scale_kernel(x_ref, s_ref, o_ref):
    """x_ref/o_ref: (1, C, tile); s_ref: (1, C, 1) f32."""
    o_ref[...] = x_ref[...] * s_ref[...].astype(o_ref.dtype)


def squeeze_and_excitation(x_nchw, w1, w2, *, hw_tile=None, force_two_phase=False):
    """x_nchw: (B, C, H, W); w1: (C, Cr); w2: (Cr, C). Returns (B, C, H, W)."""
    b, c, h, w = x_nchw.shape
    cr = w1.shape[1]
    hw = h * w
    inv_hw = 1.0 / float(hw)
    itemsize = jnp.dtype(x_nchw.dtype).itemsize

    vmem_limit = _vmem_budget_bytes()

    # In-VMEM footprint of one (1, C, HW) slab after (sublane, lane) tiling.
    sub = max(8, 32 // itemsize)                 # 8 f32, 16 bf16, 32 int8 sublane pack
    slab_bytes = _round_up(c, sub) * _round_up(hw, 128) * itemsize
    w_bytes = (w1.size * jnp.dtype(w1.dtype).itemsize
               + w2.size * jnp.dtype(w2.dtype).itemsize)
    # double-buffered in + out slabs + weights + Mosaic internal-scratch slack
    fused_footprint = 4 * slab_bytes + 2 * w_bytes + (4 << 20)

    x_flat = x_nchw.reshape(b, c, hw)            # free contiguous reshape, no pad/copy

    use_fused = (not force_two_phase) and fused_footprint <= vmem_limit

    if use_fused:
        out_flat = pl.pallas_call(
            functools.partial(_se_fused_kernel, inv_hw=inv_hw),
            out_shape=jax.ShapeDtypeStruct((b, c, hw), x_nchw.dtype),
            grid_spec=pltpu.PrefetchScalarGridSpec(
                num_scalar_prefetch=0,
                grid=(b,),
                in_specs=[
                    pl.BlockSpec((1, c, hw), lambda i: (i, 0, 0)),
                    pl.BlockSpec((c, cr), lambda i: (0, 0)),   # grid-invariant, stays resident
                    pl.BlockSpec((cr, c), lambda i: (0, 0)),
                ],
                out_specs=pl.BlockSpec((1, c, hw), lambda i: (i, 0, 0)),
            ),
            compiler_params=pltpu.CompilerParams(
                dimension_semantics=("parallel",),
                vmem_limit_bytes=vmem_limit,
            ),
        )(x_flat, w1, w2)
        return out_flat.reshape(b, c, h, w)

    # ---- two-phase path --------------------------------------------------
    # Size HW tiles to ~2 MiB of VMEM per block (dtype/C adaptive) so per-step
    # overhead is amortized and both phases sit near the HBM roofline.
    if hw_tile is None:
        target_bytes = 2 << 20
        hw_tile = max(512, _round_up(target_bytes // (_round_up(c, sub) * itemsize), 128))
    tile = max(128, _round_up(min(int(hw_tile), hw), 128))
    tile = min(tile, _round_up(hw, 128))
    n_hw = pl.cdiv(hw, tile)
    mask_tail = (hw % tile) != 0

    # Phase 1: pooled means (B, C, 1) f32 (MLP hoisted out of the kernel).
    pooled = pl.pallas_call(
        functools.partial(_se_pool_kernel, inv_hw=inv_hw, tile=tile, hw=hw,
                          mask_tail=mask_tail),
        out_shape=jax.ShapeDtypeStruct((b, c, 1), jnp.float32),
        grid_spec=pltpu.PrefetchScalarGridSpec(
            num_scalar_prefetch=0,
            grid=(b, n_hw),
            in_specs=[pl.BlockSpec((1, c, tile), lambda i, t: (i, 0, t))],
            out_specs=pl.BlockSpec((1, c, 1), lambda i, t: (i, 0, 0)),
            scratch_shapes=[pltpu.VMEM((1, c), jnp.float32)],
        ),
        compiler_params=pltpu.CompilerParams(
            dimension_semantics=("parallel", "arbitrary"),
            vmem_limit_bytes=vmem_limit,
        ),
    )(x_flat)

    # Excitation MLP: one batched (B,C)@(C,Cr) matmul in plain JAX (exact GELU).
    gates = _excite_host(pooled[:, :, 0], w1, w2)[:, :, None]   # (B, C, 1) f32

    # Phase 2: elementwise broadcast rescale, fully parallel grid.
    out_flat = pl.pallas_call(
        _se_scale_kernel,
        out_shape=jax.ShapeDtypeStruct((b, c, hw), x_nchw.dtype),
        grid_spec=pltpu.PrefetchScalarGridSpec(
            num_scalar_prefetch=0,
            grid=(b, n_hw),
            in_specs=[
                pl.BlockSpec((1, c, tile), lambda i, t: (i, 0, t)),
                pl.BlockSpec((1, c, 1), lambda i, t: (i, 0, 0)),
            ],
            out_specs=pl.BlockSpec((1, c, tile), lambda i, t: (i, 0, t)),
        ),
        compiler_params=pltpu.CompilerParams(
            dimension_semantics=("parallel", "parallel"),
            vmem_limit_bytes=vmem_limit,
        ),
    )(x_flat, gates)

    return out_flat.reshape(b, c, h, w)


def _reference(x_nchw, w1, w2):
    """Pure-JAX reference matching the PyTorch forward (exact GELU)."""
    y = jnp.mean(x_nchw, axis=(2, 3))                       # (B, C)
    y = _gelu_exact(y @ w1)
    y = jax.nn.sigmoid(y @ w2)
    return x_nchw * y[:, :, None, None]


if __name__ == "__main__":
    # Module config: channels=32, reduction=16 -> hidden = 2.
    B, C = 2, 32
    reduction = 16
    Cr = C // reduction

    key = jax.random.PRNGKey(0)
    kx1, kx2, k1, k2 = jax.random.split(key, 4)

    # PyTorch Linear weights are (out, in); stored transposed so the kernel
    # computes y @ W1 (C->Cr) and h @ W2 (Cr->C), bias=False.
    bound1 = 1.0 / math.sqrt(C)
    bound2 = 1.0 / math.sqrt(Cr)
    w1 = jax.random.uniform(k1, (C, Cr), minval=-bound1, maxval=bound1, dtype=jnp.float32)
    w2 = jax.random.uniform(k2, (Cr, C), minval=-bound2, maxval=bound2, dtype=jnp.float32)

    # Test 1: fused single-pass path, HW = 144 (NOT a multiple of 128 -> exercises
    # the unpadded full-(C,HW) block with a masked tail store).
    x1 = jax.random.normal(kx1, (B, C, 12, 12), dtype=jnp.float32)
    out1 = jax.block_until_ready(squeeze_and_excitation(x1, w1, w2))
    ref1 = _reference(x1, w1, w2)
    assert out1.shape == x1.shape
    assert jnp.allclose(out1, ref1, atol=1e-5, rtol=1e-5), "fused path mismatch vs reference"

    # Test 2: forced two-phase tiled path, HW = 400 with 128-wide tiles
    # (4 tiles, ragged 16-lane tail -> exercises in-kernel tail masking).
    x2 = jax.random.normal(kx2, (B, C, 20, 20), dtype=jnp.float32)
    out2 = jax.block_until_ready(
        squeeze_and_excitation(x2, w1, w2, hw_tile=128, force_two_phase=True))
    ref2 = _reference(x2, w1, w2)
    assert out2.shape == x2.shape
    assert jnp.allclose(out2, ref2, atol=1e-5, rtol=1e-5), "two-phase path mismatch vs reference"

    print("KERNEL_OK")
</pallas_src>

<mosaic_0001>
module attributes {stable_mosaic.version = 11 : i64} {
  func.func @_se_fused_kernel(%arg0: i32, %arg1: memref<1x32x144xf32, #tpu.memory_space<vmem>>, %arg2: memref<32x2xf32, #tpu.memory_space<vmem>>, %arg3: memref<2x32xf32, #tpu.memory_space<vmem>>, %arg4: memref<1x32x144xf32, #tpu.memory_space<vmem>>) attributes {dimension_semantics = [#tpu.dimension_semantics<parallel>], iteration_bounds = array<i64: 2>, scalar_prefetch = 0 : i64, scratch_operands = 0 : i64, tpu.core_type = #tpu.core_type<tc>, window_params = [{transform_indices = @transform_0, window_bounds = array<i64: 1, 32, 144>}, {pipeline_mode = #tpu.pipeline_mode<synchronous>, transform_indices = @transform_1, window_bounds = array<i64: 32, 2>}, {pipeline_mode = #tpu.pipeline_mode<synchronous>, transform_indices = @transform_2, window_bounds = array<i64: 2, 32>}, {transform_indices = @transform_3, window_bounds = array<i64: 1, 32, 144>}]} {
    %c0 = arith.constant 0 : index
    %c0_0 = arith.constant 0 : index
    %c0_1 = arith.constant 0 : index
    %0 = vector.load %arg1[%c0, %c0_0, %c0_1] : memref<1x32x144xf32, #tpu.memory_space<vmem>>, vector<1x32x144xf32>
    %cst = arith.constant dense<0.000000e+00> : vector<1x32xf32>
    %1 = vector.multi_reduction <add>, %0, %cst [2] : vector<1x32x144xf32> to vector<1x32xf32>
    %cst_2 = arith.constant 0.0069444445 : f32
    %2 = vector.broadcast %cst_2 : f32 to vector<1x32xf32>
    %3 = arith.mulf %1, %2 : vector<1x32xf32>
    %c0_3 = arith.constant 0 : index
    %c0_4 = arith.constant 0 : index
    %4 = vector.load %arg2[%c0_3, %c0_4] : memref<32x2xf32, #tpu.memory_space<vmem>>, vector<32x2xf32>
    %c0_5 = arith.constant 0 : index
    %c0_6 = arith.constant 0 : index
    %5 = vector.load %arg3[%c0_5, %c0_6] : memref<2x32xf32, #tpu.memory_space<vmem>>, vector<2x32xf32>
    %6 = vector.shape_cast %3 : vector<1x32xf32> to vector<1x32x1xf32>
    %7 = vector.shape_cast %4 : vector<32x2xf32> to vector<1x32x2xf32>
    %8 = vector.broadcast %6 : vector<1x32x1xf32> to vector<1x32x2xf32>
    %9 = arith.mulf %8, %7 : vector<1x32x2xf32>
    %cst_7 = arith.constant dense<0.000000e+00> : vector<1x2xf32>
    %10 = vector.multi_reduction <add>, %9, %cst_7 [1] : vector<1x32x2xf32> to vector<1x2xf32>
    %cst_8 = arith.constant 5.000000e-01 : f32
    %11 = vector.broadcast %cst_8 : f32 to vector<1x2xf32>
    %12 = arith.mulf %11, %10 : vector<1x2xf32>
    %cst_9 = arith.constant 0.707106769 : f32
    %13 = vector.broadcast %cst_9 : f32 to vector<1x2xf32>
    %14 = arith.mulf %10, %13 : vector<1x2xf32>
    %15 = math.absf %14 : vector<1x2xf32>
    %cst_10 = arith.constant 0.327591091 : f32
    %16 = vector.broadcast %cst_10 : f32 to vector<1x2xf32>
    %17 = arith.mulf %16, %15 : vector<1x2xf32>
    %cst_11 = arith.constant 1.000000e+00 : f32
    %18 = vector.broadcast %cst_11 : f32 to vector<1x2xf32>
    %19 = arith.addf %18, %17 : vector<1x2xf32>
    %cst_12 = arith.constant 1.000000e+00 : f32
    %20 = vector.broadcast %cst_12 : f32 to vector<1x2xf32>
    %21 = arith.divf %20, %19 : vector<1x2xf32>
    %cst_13 = arith.constant 1.06140542 : f32
    %22 = vector.broadcast %cst_13 : f32 to vector<1x2xf32>
    %23 = arith.mulf %22, %21 : vector<1x2xf32>
    %cst_14 = arith.constant -1.45315206 : f32
    %24 = vector.broadcast %cst_14 : f32 to vector<1x2xf32>
    %25 = arith.addf %23, %24 : vector<1x2xf32>
    %26 = arith.mulf %25, %21 : vector<1x2xf32>
    %cst_15 = arith.constant 1.42141378 : f32
    %27 = vector.broadcast %cst_15 : f32 to vector<1x2xf32>
    %28 = arith.addf %26, %27 : vector<1x2xf32>
    %29 = arith.mulf %28, %21 : vector<1x2xf32>
    %cst_16 = arith.constant -0.284496725 : f32
    %30 = vector.broadcast %cst_16 : f32 to vector<1x2xf32>
    %31 = arith.addf %29, %30 : vector<1x2xf32>
    %32 = arith.mulf %31, %21 : vector<1x2xf32>
    %cst_17 = arith.constant 0.254829586 : f32
    %33 = vector.broadcast %cst_17 : f32 to vector<1x2xf32>
    %34 = arith.addf %32, %33 : vector<1x2xf32>
    %35 = arith.mulf %34, %21 : vector<1x2xf32>
    %cst_18 = arith.constant 0.000000e+00 : f32
    %36 = vector.broadcast %cst_18 : f32 to vector<1x2xf32>
    %37 = arith.subf %36, %15 : vector<1x2xf32>
    %38 = arith.mulf %37, %15 : vector<1x2xf32>
    %39 = math.exp %38 : vector<1x2xf32>
    %40 = arith.mulf %35, %39 : vector<1x2xf32>
    %cst_19 = arith.constant 1.000000e+00 : f32
    %41 = vector.broadcast %cst_19 : f32 to vector<1x2xf32>
    %42 = arith.subf %41, %40 : vector<1x2xf32>
    %cst_20 = arith.constant 0.000000e+00 : f32
    %43 = vector.broadcast %cst_20 : f32 to vector<1x2xf32>
    %44 = arith.cmpf olt, %14, %43 : vector<1x2xf32>
    %cst_21 = arith.constant 0.000000e+00 : f32
    %45 = vector.broadcast %cst_21 : f32 to vector<1x2xf32>
    %46 = arith.subf %45, %42 : vector<1x2xf32>
    %47 = arith.select %44, %46, %42 : vector<1x2xi1>, vector<1x2xf32>
    %cst_22 = arith.constant 1.000000e+00 : f32
    %48 = vector.broadcast %cst_22 : f32 to vector<1x2xf32>
    %49 = arith.addf %48, %47 : vector<1x2xf32>
    %50 = arith.mulf %12, %49 : vector<1x2xf32>
    %51 = vector.shape_cast %50 : vector<1x2xf32> to vector<1x2x1xf32>
    %52 = vector.shape_cast %5 : vector<2x32xf32> to vector<1x2x32xf32>
    %53 = vector.broadcast %51 : vector<1x2x1xf32> to vector<1x2x32xf32>
    %54 = arith.mulf %53, %52 : vector<1x2x32xf32>
    %cst_23 = arith.constant dense<0.000000e+00> : vector<1x32xf32>
    %55 = vector.multi_reduction <add>, %54, %cst_23 [1] : vector<1x2x32xf32> to vector<1x32xf32>
    %56 = arith.negf %55 : vector<1x32xf32>
    %57 = math.exp %56 : vector<1x32xf32>
    %cst_24 = arith.constant 1.000000e+00 : f32
    %58 = vector.broadcast %cst_24 : f32 to vector<1x32xf32>
    %59 = arith.addf %58, %57 : vector<1x32xf32>
    %60 = arith.divf %58, %59 : vector<1x32xf32>
    %c0_25 = arith.constant 0 : index
    %c0_26 = arith.constant 0 : index
    %c0_27 = arith.constant 0 : index
    %61 = vector.load %arg1[%c0_25, %c0_26, %c0_27] : memref<1x32x144xf32, #tpu.memory_space<vmem>>, vector<1x32x144xf32>
    %62 = vector.shape_cast %60 : vector<1x32xf32> to vector<1x32x1xf32>
    %63 = vector.broadcast %62 : vector<1x32x1xf32> to vector<1x32x144xf32>
    %64 = arith.mulf %61, %63 : vector<1x32x144xf32>
    %c0_28 = arith.constant 0 : index
    %c0_29 = arith.constant 0 : index
    %c0_30 = arith.constant 0 : index
    %65 = vector.load %arg4[%c0_28, %c0_29, %c0_30] : memref<1x32x144xf32, #tpu.memory_space<vmem>>, vector<1x32x144xf32>
    tpu.vector_store %arg4[%c0_28, %c0_29, %c0_30], %64 {strides = array<i32>} : memref<1x32x144xf32, #tpu.memory_space<vmem>>, vector<1x32x144xf32>,
    return
  }
  func.func @transform_0(%arg0: i32) -> (i32, i32, i32) {
    %c0_i32 = arith.constant 0 : i32
    %c0_i32_0 = arith.constant 0 : i32
    %c0_i32_1 = arith.constant 0 : i32
    return %arg0, %c0_i32, %c0_i32_0 : i32, i32, i32
  }
  func.func @transform_1(%arg0: i32) -> (i32, i32) {
    %c0_i32 = arith.constant 0 : i32
    %c0_i32_0 = arith.constant 0 : i32
    %c0_i32_1 = arith.constant 0 : i32
    return %c0_i32, %c0_i32_0 : i32, i32
  }
  func.func @transform_2(%arg0: i32) -> (i32, i32) {
    %c0_i32 = arith.constant 0 : i32
    %c0_i32_0 = arith.constant 0 : i32
    %c0_i32_1 = arith.constant 0 : i32
    return %c0_i32, %c0_i32_0 : i32, i32
  }
  func.func @transform_3(%arg0: i32) -> (i32, i32, i32) {
    %c0_i32 = arith.constant 0 : i32
    %c0_i32_0 = arith.constant 0 : i32
    %c0_i32_1 = arith.constant 0 : i32
    return %arg0, %c0_i32, %c0_i32_0 : i32, i32, i32
  }
}

</mosaic_0001>

<bundles_post_ra>
// kernel: tpu_custom_call.1
= control target key start
LH: loop header
LB: loop body
LE: loop exit
PB: predicated region body
PF: predicated region fallthrough
CT: control target
= control target key end

     0   :  { %8 = vsyncpa [#allocation3], 0  ;;  %s840_s0 = inlined_call_operand.hbm [shape: f32[2,32,144], index: 0, kind: input, shape index: {}]   ;;  %s841_s1 = inlined_call_operand.vmem [shape: f32[32,2], index: 1, kind: input, shape index: {}]   ;;  %s842_s2 = inlined_call_operand.vmem [shape: f32[2,32], index: 2, kind: input, shape index: {}]   ;;  %s843_s3 = inlined_call_operand.hbm [shape: f32[2,32,144], index: 3, kind: output, shape index: {}]  }
   0x1   :  { %10 = vsyncpa [#allocation3 + $0x1], 0 }
   0x2   :  { %11 = vsyncpa [#allocation4], 0 }
   0x3   :  { %13 = vsyncpa [#allocation4 + $0x1], 0  ;;  %s648_s12 = smov 0   ;;  %s650_s13 = smov 0  }
   0x4   :  { %s652_s14 = smov 0   ;;  %s654_s15 = smov 0  }
   0x5 LB: > { %s669_s16 = sadd.s32 4294967295, %s622_s15   ;;  %s446_s17 = sadd.s32 4294967294, %s622_s15   ;;  %s622_s15 = sphi %s654_s15, %s853_s15   ;;  %s618_s14 = sphi %s652_s14, %s852_s14   ;;  %s614_s13 = sphi %s650_s13, %s851_s13   ;;  %s610_s12 = sphi %s648_s12, %s850_s12  }
   0x6   : > { %s673_s18 = sadd.s32 1, %s622_s15   ;;  %s26_s19 = sadd.s32 1, %s618_s14 }
   0x7   : > { %s23_s20 = ssub.s32 %s622_s15, %s673_s18  ;;  %p33_p0 = scmp.ne.s32.totalorder %s618_s14, %s614_s13 }
   0x8   : > { %p24_p1 = scmp.eq.s32.totalorder %s23_s20, 0  ;;  %p34_p2 = scmp.eq.s32.totalorder %s622_s15, 0 }
   0x9   : > { %p39_p3 = scmp.ne.s32.totalorder %s614_s13, %s610_s12  ;;  %p40_p4 = scmp.eq.s32.totalorder %s669_s16, 0 }
   0xa   : > { %s685_s21 = scalar_select %p24_p1, %s618_s14, %s26_s19  }
   0xb   : > { %p687_p5 = por %p34_p2, %p33_p0  ;;  %p691_p6 = por %p40_p4, %p39_p3 }
   0xc   : > { %p105_p7 = scmp.eq.s32.totalorder %s669_s16, 1  ;;  %p111_p8 = scmp.eq.s32.totalorder %s446_s17, 1 }
   0xd   : > { %p475_p10 = scmp.lt.s32.totalorder %s622_s15, 2  ;;  %s137_s26 = sand.u32 1, %s618_s14  }
   0xe   : > { %p698_p11 = por %p105_p7, %p33_p0  ;;  %p702_p12 = por %p111_p8, %p39_p3 }
   0xf   : > { %s461_s27 = sshll.u32 %s622_s15, 6  ;;  %s449_s28 = sshll.u32 %s137_s26, 6 }
  0x10   : > { %s146_s4 = scalar_lea.hbm %s840_s0, %s461_s27  ;;  %s141_s6 = scalar_lea.vmem [#allocation2], %s449_s28 }
  0x11   : > { %s147_s5 = sshll.u32 %s146_s4, 4  ;;  %s149_s7 = sshll.u32 %s141_s6, 4  ;;  %s148_s5 = int_to_ptr.hbm [resolvable:$true] %s147_s5  ;;  %s150_s7 = int_to_ptr.vmem [resolvable:$true] %s149_s7 }
  0x12   : > { %p713_p13 = pnand %p475_p10, %p687_p5  ;;  %p452_p0 = scmp.ge.s32.totalorder %s622_s15, 1 }
  0x13   : > { %p157_p1 = scmp.lt.s32.totalorder %s622_s15, 3  ;;  %s138_s9 = scalar_lea.sflag [#allocation3], %s137_s26 }
  0x14   : > { %s526_s10 = sshra.s32 %s148_s5, 4  ;;  %p530_p3 = pneg %p713_p13  ;;  %s527_s10 = int_to_ptr.hbm [resolvable:$true] %s526_s10 }
  0x15   : > { %s528_s11 = scalar_lea.hbm %s527_s10, 64  ;;  %s533_s20 = scalar_lea.hbm %s840_s0, 128 }
  0x16   : > { %p529_p2 = scmp.ne.s32.totalorder %s527_s10, %s528_s11  ;;  %p534_p5 = scmp.lt.s32.totalorder %s527_s10, %s840_s0 }
  0x17   : > { %p535_p8 = scmp.lt.s32.totalorder %s533_s20, %s528_s11 }
  0x18   : > { %p531_p4 = pnand %p530_p3, %p529_p2 }
  0x19   : > { %p536_p10 = por %p535_p8, %p534_p5 }
  0x1a   : > { %p532_p7 = pneg %p531_p4 }
  0x1c   : > { %p537_p9 = pnand %p536_p10, %p532_p7 }
  0x1e   : > { %540 = shalt.err (!%p537_p9)
}
  0x1f   : > { %s624_s26 = smov 256   ;;  %s625_s28 = smov 16  }
  0x20   : > { %470 = dma.hbm_to_vmem [thread:$0]  (!%p713_p13), %s148_s5, 1024, %s150_s7, %s138_s9, %s624_s26, %s624_s26, %s625_s28  }
  0x21   : > { %p158_p2 = pnand %p452_p0, %p157_p1 }
  0x22   : > { %s734_s29 = sand.u32 (!%p158_p2), 1, %s614_s13  }
  0x23   : > { %161 = sbr.rel (%p158_p2) target bundleno = 504 (0x1f8), region = 32  ;;  %s453_s30 = sshll.u32 (!%p158_p2), %s734_s29, 6 }
  0x24   : > { %s164_s4 = scalar_lea.sflag (!%p158_p2), [#allocation3], %s734_s29  ;;  %s167_s6 = scalar_lea.vmem (!%p158_p2), [#allocation2], %s453_s30 }
  0x28   : > { %601 = dma.done.wait (%p691_p6), %s164_s4, 1024  }
  0x29   : > { %603 = vsyncadd (%p691_p6), %s164_s4, 4294966272  ;;  %vm199_vm0 = vcmask 130048   ;;  %v744_v0 = vld [vmem:[%s167_s6] sm:$0xff]  ;;  %v746_v1 = vld [vmem:[%s167_s6 + $0x8] sm:$0xff]  ;;  %v283_v16 = vlaneseq  ;;  %vm229_vm1 = vcmask 15360   ;;  %vm290_vm7 = vcmask 254976  }
  0x2a   : > { %v748_v2 = vld [vmem:[%s167_s6 + $0x20] sm:$0xff]  ;;  %v200_v3 = vsel %vm199_vm0, %v746_v1, 0.0  ;;  %v752_v4 = vld [vmem:[%s167_s6 + $0x28] sm:$0xff]  ;;  %v757_v7 = vld [vmem:[%s167_s6 + $0x18] sm:$0xff]  ;;  %s190_s22 = scalar_lea.vmem [#allocation5], %s453_s30  ;;  %s462_s27 = sshll.u32 %s669_s16, 6 }
  0x2b   : > { %v201_v5 = vadd.f32 %v200_v3, %v744_v0  ;;  %v208_v6 = vsel %vm199_vm0, %v752_v4, 0.0  ;;  %v760_v9 = vld [vmem:[%s167_s6 + $0x38] sm:$0xff]  ;;  %v762_v10 = vld [vmem:[%s167_s6 + $0x10] sm:$0xff]  ;;  %v204_v11 = vsel %vm199_vm0, %v757_v7, 0.0  ;;  %v772_v17 = vshrl.u32 %v283_v16, 7  ;;  %v220_v21 = vld [vmem:[%s841_s1] sm:$0xff]  ;;  %s369_s4 = scalar_lea.hbm %s843_s3, %s462_s27 }
  0x2c   : > { %v209_v8 = vadd.f32 %v208_v6, %v748_v2  ;;  %v766_v12 = vld [vmem:[%s167_s6 + $0x30] sm:$0xff]  ;;  %v212_v13 = vsel %vm199_vm0, %v760_v9, 0.0  ;;  %v205_v14 = vadd.f32 %v204_v11, %v762_v10  ;;  %v221_v24 = vld [vmem:[%s841_s1 + $0x8] sm:$0xff]  ;;  %v223_v28 = vld [vmem:[%s841_s1 + $0x18] sm:$0xff]  ;;  %s370_s6 = sshll.u32 %s190_s22, 4  ;;  %s372_s30 = sshll.u32 %s369_s4, 4  ;;  %s371_s6 = int_to_ptr.vmem [resolvable:$true] %s370_s6  ;;  %s373_s30 = int_to_ptr.hbm [resolvable:$true] %s372_s30 }
  0x2d   : > { %202 = vadd.xlane.f32.xlu0 %v201_v5  ;;  %v213_v15 = vadd.f32 %v212_v13, %v766_v12  ;;  %513 = vset.pattern.permute.xlu2 %v772_v17  ;;  %v222_v23 = vld [vmem:[%s841_s1 + $0x10] sm:$0xff]  ;;  %s358_s16 = scalar_lea.sflag [#allocation4], %s734_s29  ;;  %s570_s23 = sshra.s32 %s373_s30, 4  ;;  %s571_s23 = int_to_ptr.hbm [resolvable:$true] %s570_s23 }
  0x2e   : > { %210 = vadd.xlane.f32.xlu1 %v209_v8  ;;  %s572_s5 = scalar_lea.hbm %s571_s23, 64  ;;  %s576_s9 = scalar_lea.hbm %s843_s3, 128 }
  0x2f   : > { %p573_p6 = scmp.ne.s32.totalorder %s571_s23, %s572_s5  ;;  %p577_p0 = scmp.lt.s32.totalorder %s571_s23, %s843_s3 }
  0x30   : > { %p578_p1 = scmp.lt.s32.totalorder %s576_s9, %s572_s5 }
  0x31   : > { %p574_p9 = pnand %p573_p6, %p698_p11 }
  0x32   : > { %p579_p3 = por %p578_p1, %p577_p0 }
  0x33   : > { %p575_p13 = pneg %p574_p9 }
  0x35   : > { %206 = vadd.xlane.f32.xlu0 %v205_v14  ;;  %p580_p4 = pnand %p579_p3, %p575_p13 }
  0x36   : > { %214 = vadd.xlane.f32.xlu1 %v213_v15 }
  0xa0   : > { %v203_v18 = vpop.xlane.xlu0 %202 }
  0xa1   : > { %v211_v19 = vpop.xlane.xlu1 %210  ;;  %v216_v20 = vmul.f32 0.0069444445, %v203_v18 }
  0xa2   : > { %v218_v22 = vmul.f32 0.0069444445, %v211_v19 }
  0xa3   : > { %v225_v26 = vmul.f32 %v220_v21, %v216_v20 }
  0xa4   : > { %v227_v31 = vmul.f32 %v222_v23, %v218_v22 }
  0xa5   : > { %v230_v34 = vsel %vm229_vm1, %v225_v26, 0.0  ;;  %v331_v26 = vadd.s32 16, %v772_v17 }
  0xa6   : > { %v233_v37 = vsel %vm229_vm1, %v227_v31, 0.0 }
  0xa7   : > { %515 = vset.pattern.permute.xlu1 %v331_v26 }
  0xa8   : > { %v207_v25 = vpop.xlane.xlu0 %206 }
  0xa9   : > { %v217_v27 = vmul.f32 0.0069444445, %v207_v25  ;;  %v215_v29 = vpop.xlane.xlu1 %214 }
  0xaa   : > { %v219_v30 = vmul.f32 0.0069444445, %v215_v29 }
  0xab   : > { %v226_v32 = vmul.f32 %v221_v24, %v217_v27  ;;  %v325_v27 = vadd.s32 8, %v772_v17 }
  0xac   : > { %v228_v33 = vmul.f32 %v223_v28, %v219_v30  ;;  %v224_v28 = vld [vmem:[%s842_s2] sm:$0x3] }
  0xad   : > { %v231_v35 = vsel %vm229_vm1, %v226_v32, 0.0  ;;  %514 = vset.pattern.permute.xlu0 %v325_v27 }
  0xae   : > { %v232_v36 = vadd.f32 %v231_v35, %v230_v34  ;;  %v235_v38 = vsel %vm229_vm1, %v228_v33, 0.0 }
  0xb0   : > { %v234_v39 = vadd.f32 %v233_v37, %v232_v36 }
  0xb2   : > { %v236_v40 = vadd.f32 %v235_v38, %v234_v39 }
  0xb4   : > { %v237_v41 = vrot.slane %v236_v40, 4 }
  0xb6   : > { %v238_v42 = vadd.f32 %v237_v41, %v236_v40 }
  0xb8   : > { %v239_v43 = vrot.slane %v238_v42, 2 }
  0xba   : > { %v240_v44 = vadd.f32 %v239_v43, %v238_v42 }
  0xbc   : > { %v241_v45 = vrot.slane %v240_v44, 1 }
  0xbe   : > { %v242_v46 = vadd.f32 %v241_v45, %v240_v44 }
  0xc0   : > { %v244_v47 = vmul.f32 0.70710677, %v242_v46  ;;  %v243_v23 = vmul.f32 0.5, %v242_v46 }
  0xc2   : > { %v245_v48 = vand.u32 2147483647, %v244_v47  ;;  %vm278_vm6 = vcmp.lt.f32.partialorder %v244_v47, 0.0 }
  0xc4   : > { %v246_v49 = vmul.f32 0.3275911, %v245_v48  ;;  %v272_v61 = vsub.f32 0.0, %v245_v48 }
  0xc6   : > { %v247_v50 = vadd.f32 1.0, %v246_v49  ;;  %v273_v3 = vmul.f32 %v272_v61, %v245_v48 }
  0xc8   : > { %518 = vrcp.f32 %v247_v50  ;;  %v259_v54 = vand.u32 2147483648, %v247_v50  ;;  %v257_v56 = vand.u32 2147483647, %v247_v50  ;;  %vm253_vm3 = vweird.f32 %v247_v50 }
  0xc9   : > { %v274_v8 = vmul.f32 1.442695, %v273_v3 }
  0xca   : > { %v260_v58 = vor.u32 1.1754944e-38, %v259_v54  ;;  %vm258_vm5 = vcmp.eq.f32.partialorder %v257_v56, 8.507059e+37 }
  0xcb   : > { %520 = vpow2.f32 %v274_v8 }
  0xce   : > { %v519_v51 = vpop.eup %518 }
  0xcf   : > { %v249_v52 = vmul.f32 %v519_v51, %v247_v50  ;;  %vm254_vm2 = vweird.f32 %v519_v51 }
  0xd0   : > { %vm255_vm4 = vmor %vm253_vm3, %vm254_vm2 }
  0xd1   : > { %v250_v53 = vsub.f32 1.0, %v249_v52  ;;  %v521_v18 = vpop.eup %520 }
  0xd3   : > { %v251_v55 = vmul.f32 %v519_v51, %v250_v53 }
  0xd5   : > { %v252_v57 = vadd.f32 %v519_v51, %v251_v55 }
  0xd7   : > { %v256_v59 = vsel %vm255_vm4, %v519_v51, %v252_v57  ;;  %v337_v51 = vadd.s32 24, %v772_v17 }
  0xd8   : > { %v261_v60 = vsel %vm258_vm5, %v260_v58, %v256_v59 }
  0xd9   : > { %v263_v62 = vmul.f32 1.0614054, %v261_v60 }
  0xdb   : > { %v264_v63 = vadd.f32 -1.4531521, %v263_v62 }
  0xdd   : > { %v265_v5 = vmul.f32 %v264_v63, %v261_v60 }
  0xdf   : > { %v266_v6 = vadd.f32 1.4214138, %v265_v5 }
  0xe1   : > { %v267_v11 = vmul.f32 %v266_v6, %v261_v60 }
  0xe3   : > { %v268_v13 = vadd.f32 -0.28449672, %v267_v11 }
  0xe5   : > { %v269_v14 = vmul.f32 %v268_v13, %v261_v60 }
  0xe7   : > { %v270_v15 = vadd.f32 0.2548296, %v269_v14 }
  0xe9   : > { %v271_v16 = vmul.f32 %v270_v15, %v261_v60 }
  0xeb   : > { %v276_v19 = vmul.f32 %v521_v18, %v271_v16 }
  0xed   : > { %v277_v20 = vsub.f32 1.0, %v276_v19 }
  0xef   : > { %v279_v21 = vsub.f32 0.0, %v277_v20 }
  0xf1   : > { %v280_v22 = vsel %vm278_vm6, %v279_v21, %v277_v20 }
  0xf2   : > { %v281_v24 = vadd.f32 1.0, %v280_v22 }
  0xf4   : > { %v282_v25 = vmul.f32 %v281_v24, %v243_v23 }
  0xf6   : > { %287 = vperm.xlu2 %513, %v282_v25  }
 0x150   : > { %v288_v29 = vpop.permute.xlu2 %287 }
 0x151   : > { %v289_v30 = vmul.f32 %v288_v29, %v224_v28 }
 0x153   : > { %v291_v31 = vsel %vm290_vm7, %v289_v30, 0.0 }
 0x154   : > { %v292_v32 = vrot.slane %v291_v31, 4 }
 0x156   : > { %v293_v33 = vadd.f32 %v292_v32, %v291_v31 }
 0x158   : > { %v294_v34 = vrot.slane %v293_v33, 2 }
 0x15a   : > { %v295_v35 = vadd.f32 %v294_v34, %v293_v33 }
 0x15c   : > { %v296_v36 = vrot.slane %v295_v35, 1 }
 0x15e   : > { %v297_v37 = vadd.f32 %v296_v36, %v295_v35 }
 0x160   : > { %v455_v38 = vmul.f32 -1.442695, %v297_v37 }
 0x162   : > { %522 = vpow2.f32 %v455_v38 }
 0x168   : > { %v523_v39 = vpop.eup %522 }
 0x169   : > { %v301_v40 = vadd.f32 1.0, %v523_v39 }
 0x16b   : > { %524 = vrcp.f32 %v301_v40  ;;  %v313_v44 = vand.u32 2147483648, %v301_v40  ;;  %v311_v46 = vand.u32 2147483647, %v301_v40  ;;  %vm307_vm9 = vweird.f32 %v301_v40 }
 0x16d   : > { %v314_v48 = vor.u32 1.1754944e-38, %v313_v44  ;;  %vm312_vm11 = vcmp.eq.f32.partialorder %v311_v46, 8.507059e+37 }
 0x171   : > { %v525_v41 = vpop.eup %524 }
 0x172   : > { %v303_v42 = vmul.f32 %v525_v41, %v301_v40  ;;  %vm308_vm8 = vweird.f32 %v525_v41 }
 0x173   : > { %vm309_vm10 = vmor %vm307_vm9, %vm308_vm8 }
 0x174   : > { %v304_v43 = vsub.f32 1.0, %v303_v42 }
 0x176   : > { %v305_v45 = vmul.f32 %v525_v41, %v304_v43 }
 0x178   : > { %v306_v47 = vadd.f32 %v525_v41, %v305_v45 }
 0x17a   : > { %v310_v49 = vsel %vm309_vm10, %v525_v41, %v306_v47 }
 0x17b   : > { %v315_v50 = vsel %vm312_vm11, %v314_v48, %v310_v49 }
 0x17c   : > { %333 = vperm.xlu1 %515, %v315_v50   ;;  %327 = vperm.xlu0 %514, %v315_v50  }
 0x17d   : > { %321 = vperm.xlu2 %513, %v315_v50  }
 0x184   : > { %517 = vset.pattern.permute.xlu0 %v337_v51 }
 0x185   : > { %516 = vset.pattern.permute.xlu2 %v337_v51 }
 0x18d   : > { %339 = vperm.xlu2 %516, %v315_v50  }
 0x1d7   : > { %v322_v52 = vpop.permute.xlu2 %321 }
 0x1d8   : > { %v341_v53 = vmul.f32 %v322_v52, %v744_v0  ;;  %v342_v54 = vmul.f32 %v322_v52, %v746_v1 }
 0x1da   : > { %349 = vst [vmem:[%s190_s22] sm:$0xff] %v341_v53 }
 0x1db   : > { %350 = vst.msk [vmem:[%s190_s22 + $0x8] sm:$0xff] %vm199_vm0, %v342_v54 }
 0x1e7   : > { %v340_v55 = vpop.permute.xlu2 %339 }
 0x1e8   : > { %v347_v56 = vmul.f32 %v340_v55, %v766_v12  ;;  %v348_v57 = vmul.f32 %v340_v55, %v760_v9 }
 0x1ea   : > { %355 = vst [vmem:[%s190_s22 + $0x30] sm:$0xff] %v347_v56 }
 0x1eb   : > { %356 = vst.msk [vmem:[%s190_s22 + $0x38] sm:$0xff] %vm199_vm0, %v348_v57 }
 0x1ee   : > { %v334_v0 = vpop.permute.xlu1 %333  ;;  %v328_v1 = vpop.permute.xlu0 %327 }
 0x1ef   : > { %v345_v17 = vmul.f32 %v334_v0, %v748_v2  ;;  %v346_v12 = vmul.f32 %v334_v0, %v752_v4  ;;  %v343_v9 = vmul.f32 %v328_v1, %v762_v10  ;;  %v344_v58 = vmul.f32 %v328_v1, %v757_v7 }
 0x1f1   : > { %353 = vst [vmem:[%s190_s22 + $0x20] sm:$0xff] %v345_v17 }
 0x1f2   : > { %354 = vst.msk [vmem:[%s190_s22 + $0x28] sm:$0xff] %vm199_vm0, %v346_v12 }
 0x1f3   : > { %351 = vst [vmem:[%s190_s22 + $0x10] sm:$0xff] %v343_v9 }
 0x1f4   : > { %352 = vst.msk [vmem:[%s190_s22 + $0x18] sm:$0xff] %vm199_vm0, %v344_v58 }
 0x1f5   : > { %583 = shalt.err (!%p580_p4)
}
 0x1f6   : > { %s626_s29 = smov 256   ;;  %s627_s17 = smov 16  }
 0x1f7   : > { %465 = dma.vmem_to_hbm [thread:$0]  (%p698_p11), %s371_s6, 1024, %s373_s30, %s358_s16, %s626_s29, %s626_s29, %s627_s17  }
 0x1f8 PF: > { %s387_s19 = sand.u32 1, %s610_s12   ;;  %p849_p7 = scmp.ge.s32.totalorder %s622_s15, 2 }
 0x1f9   : > { %s388_s20 = scalar_lea.sflag [#allocation4], %s387_s19 }
 0x1fa   : > { %p472_p5 = pnand %p849_p7, %p702_p12 }
 0x1fc   : > { %p473_p8 = pneg %p472_p5 }
 0x1fe   : > { %605 = dma.done.wait (%p473_p8), %s388_s20, 1024  }
 0x1ff   : > { %607 = vsyncadd (%p473_p8), %s388_s20, 4294966272  ;;  %p16_p10 = scmp.ge.s32.totalorder %s673_s18, 4   ;;  %s850_s12 = smov %s614_s13 }
 0x200   : > { %s851_s13 = smov %s618_s14  ;;  %s852_s14 = smov %s685_s21 }
 0x201   : > { %s853_s15 = smov %s673_s18  ;;  %18 = sbr.rel (!%p16_p10) target bundleno = 5 (0x5), region = 77 }
 0x206   :  { %394 = vsyncpa [#allocation3], 1 }
 0x207   :  { %396 = vsyncpa [#allocation3 + $0x1], 1 }
 0x208   :  { %397 = vsyncpa [#allocation4], 1 }
 0x209   :  { %399 = vsyncpa [#allocation4 + $0x1], 1 }

</bundles_post_ra>
